<compile_context>
chip_gen: v6e
topology: v6e:2x2x1
jax: 0.10.0
libtpu: 0.0.40
codegen_flags: <defaults>
</compile_context>

<pallas_src>
import functools

import jax
import jax.numpy as jnp
from jax.experimental import pallas as pl
from jax.experimental.pallas import tpu as pltpu


_BIG = 1e30


def _triplet_kernel(xr_ref, xc_ref, sqr_ref, sqc_ref, tr_ref, tc_ref,
                    out_ref, ap_acc, an_acc, *, margin, n, tm):
    i = pl.program_id(0)
    j = pl.program_id(1)

    @pl.when(j == 0)
    def _():
        ap_acc[...] = jnp.full_like(ap_acc, -_BIG)
        an_acc[...] = jnp.full_like(an_acc, _BIG)

    # Gram strip on the MXU: (tm, dp) x (tn, dp) contracted on the feature
    # axis (q @ k^T form), f32 accumulation, inputs in native dtype.
    gram = jax.lax.dot_general(
        xr_ref[...], xc_ref[...],
        dimension_numbers=(((1,), (1,)), ((), ())),
        preferred_element_type=jnp.float32)                       # (tm, tn)

    dist2 = (sqr_ref[...] + sqc_ref[...]) - 2.0 * gram            # (tm, tn)
    same = tr_ref[...] == tc_ref[...]                             # (tm, tn)

    big = jnp.float32(_BIG)
    # Padded columns: label -1 never matches a real row (excluded from the
    # positive max) and their squared norm is +1e30 (excluded from the
    # negative min) -- no explicit column mask needed.
    ap_acc[...] = jnp.maximum(
        ap_acc[...],
        jnp.max(jnp.where(same, dist2, -big), axis=1, keepdims=True))
    an_acc[...] = jnp.minimum(
        an_acc[...],
        jnp.min(jnp.where(same, big, dist2), axis=1, keepdims=True))

    @pl.when(j == pl.num_programs(1) - 1)
    def _():
        # clamp-then-sqrt only on the reduced (tm, 1) vectors (EUP).
        dist_ap = jnp.sqrt(jnp.maximum(ap_acc[...], 1e-12))
        dist_an = jnp.sqrt(jnp.maximum(an_acc[...], 1e-12))

        row_ids = i * tm + jax.lax.broadcasted_iota(jnp.int32, (tm, 1), 0)
        row_ok = row_ids < n

        per = jnp.maximum(dist_ap - dist_an + jnp.float32(margin), 0.0)
        per = jnp.where(row_ok, per, 0.0)
        corr = jnp.where(row_ok & (dist_an >= dist_ap), 1.0, 0.0)

        loss_part = jnp.sum(per, axis=(0, 1), keepdims=True)       # (1, 1)
        corr_part = jnp.sum(corr, axis=(0, 1), keepdims=True)      # (1, 1)

        # Pack both per-row-tile scalars into one lane-dense (8, 128) block.
        r8 = jax.lax.broadcasted_iota(jnp.int32, (8, 128), 0)
        c128 = jax.lax.broadcasted_iota(jnp.int32, (8, 128), 1)
        out_ref[...] = jnp.where(
            (r8 == 0) & (c128 == 0), loss_part,
            jnp.where((r8 == 0) & (c128 == 1), corr_part, jnp.float32(0.0)))


def ori_triplet_loss(inputs, targets, margin=0.3):
    """JAX/Pallas equivalent of OriTripletLoss.forward.

    Args:
      inputs:  (batch, feat_dim) float features (f32 or bf16)
      targets: (batch,) integer labels
    Returns:
      (loss: f32 scalar, correct: int32 scalar)
    """
    n, d = inputs.shape
    dp = ((d + 127) // 128) * 128            # lane-dense feature axis

    # Row/column tile: 256 for larger batches (full MXU strips on v6e/v7x),
    # else 128 (gives >=2 row tiles for 128 < n <= 256 so the "parallel"
    # axis can shard across v7x's two TensorCores).  Batch padded to a
    # multiple of the tile; padded rows/columns are excluded via -1 labels,
    # +1e30 norms and the row-validity mask.
    tm = 256 if n > 256 else 128
    tn = tm
    n_pad = ((n + tm - 1) // tm) * tm

    x = inputs
    if dp != d or n_pad != n:
        x = jnp.pad(x, ((0, n_pad - n), (0, dp - d)))

    t = targets.astype(jnp.int32)
    if n_pad != n:
        t = jnp.pad(t, (0, n_pad - n), constant_values=-1)

    # Squared norms computed once in f32; padded entries pushed to +BIG so
    # padded columns fall out of the hard-negative min naturally.
    x32 = x.astype(jnp.float32)
    sq = jnp.sum(x32 * x32, axis=1)
    sq = jnp.where(jnp.arange(n_pad) < n, sq, jnp.float32(_BIG))

    sq_row = sq.reshape(n_pad, 1)
    sq_col = sq.reshape(1, n_pad)
    t_row = t.reshape(n_pad, 1)
    t_col = t.reshape(1, n_pad)

    num_i = n_pad // tm
    num_j = n_pad // tn

    # VMEM estimate from the actual working set (double-buffered streamed
    # tiles + in-flight (tm, tn) f32 temporaries + scratch), capped by the
    # device's physical VMEM (v7x = 64 MiB/TC).
    itemsize = jnp.dtype(x.dtype).itemsize
    est = (2 * tm * dp * itemsize          # row strip of x (double-buffered)
           + 2 * tn * dp * itemsize        # column strip of x (double-buffered)
           + 4 * tm * tn * 4               # gram/dist2/mask temporaries
           + 4 * (tm + tn) * 8             # norms + labels (tiny, padded)
           + 2 * tm * 128 * 4              # ap/an accumulators (tile-padded)
           + 2 * 8 * 128 * 4               # packed output block
           + (2 << 20))                    # headroom
    try:
        cap = int(pltpu.get_tpu_info().vmem_capacity_bytes) - (8 << 20)
    except Exception:
        cap = 56 << 20
    vmem_limit = int(min(max(est, 16 << 20), cap))

    kernel = functools.partial(_triplet_kernel, margin=float(margin),
                               n=n, tm=tm)

    out = pl.pallas_call(
        kernel,
        out_shape=jax.ShapeDtypeStruct((num_i * 8, 128), jnp.float32),
        grid=(num_i, num_j),
        in_specs=[
            pl.BlockSpec((tm, dp), lambda i, j: (i, 0)),   # row strip of x
            pl.BlockSpec((tn, dp), lambda i, j: (j, 0)),   # column strip of x
            pl.BlockSpec((tm, 1), lambda i, j: (i, 0)),    # row sq-norms
            pl.BlockSpec((1, tn), lambda i, j: (0, j)),    # column sq-norms
            pl.BlockSpec((tm, 1), lambda i, j: (i, 0)),    # row labels
            pl.BlockSpec((1, tn), lambda i, j: (0, j)),    # column labels
        ],
        out_specs=pl.BlockSpec((8, 128), lambda i, j: (i, 0)),
        scratch_shapes=[pltpu.VMEM((tm, 1), jnp.float32),
                        pltpu.VMEM((tm, 1), jnp.float32)],
        compiler_params=pltpu.CompilerParams(
            dimension_semantics=("parallel", "arbitrary"),
            vmem_limit_bytes=vmem_limit),
    )(x, x, sq_row, sq_col, t_row, t_col)

    loss = jnp.sum(out[:, 0]) / jnp.float32(n)
    # TODO(synk): PyTorch returns a Python int via .item(); here it is an
    # int32 scalar.
    correct = jnp.sum(out[:, 1]).astype(jnp.int32)
    return loss, correct


def _reference(inputs, targets, margin=0.3):
    # Pure-JAX reference mirroring the PyTorch code, for validation.
    x = inputs.astype(jnp.float32)
    sq = jnp.sum(x * x, axis=1, keepdims=True)
    dist = jnp.sqrt(jnp.clip(sq + sq.T - 2.0 * x @ x.T, 1e-12, None))
    mask = targets[:, None] == targets[None, :]
    dist_ap = jnp.max(jnp.where(mask, dist, -jnp.inf), axis=1)
    dist_an = jnp.min(jnp.where(mask, jnp.inf, dist), axis=1)
    loss = jnp.mean(jnp.maximum(dist_ap - dist_an + margin, 0.0))
    correct = jnp.sum(dist_an >= dist_ap)
    return loss, correct


if __name__ == "__main__":
    key = jax.random.PRNGKey(0)
    k1, k2 = jax.random.split(key)

    # Case 1: batch multiple of 8, small feature dim (padded to 128 lanes).
    inputs1 = jax.random.normal(k1, (8, 32), dtype=jnp.float32)
    targets1 = jnp.array([0, 0, 1, 1, 2, 2, 3, 3], dtype=jnp.int32)
    loss1, correct1 = ori_triplet_loss(inputs1, targets1, margin=0.3)
    jax.block_until_ready((loss1, correct1))
    ref_loss1, ref_correct1 = _reference(inputs1, targets1, margin=0.3)
    assert abs(float(loss1) - float(ref_loss1)) < 1e-3, (float(loss1), float(ref_loss1))
    assert int(correct1) == int(ref_correct1), (int(correct1), int(ref_correct1))

    # Case 2: unaligned batch/feat exercising the padding + validity handling.
    inputs2 = jax.random.normal(k2, (10, 48), dtype=jnp.float32)
    targets2 = jnp.array([0, 0, 1, 1, 2, 2, 3, 3, 4, 4], dtype=jnp.int32)
    loss2, correct2 = ori_triplet_loss(inputs2, targets2, margin=0.3)
    jax.block_until_ready((loss2, correct2))
    ref_loss2, ref_correct2 = _reference(inputs2, targets2, margin=0.3)
    assert abs(float(loss2) - float(ref_loss2)) < 1e-3, (float(loss2), float(ref_loss2))
    assert int(correct2) == int(ref_correct2), (int(correct2), int(ref_correct2))

    print("KERNEL_OK")
</pallas_src>

<mosaic_0001>
module attributes {stable_mosaic.version = 11 : i64} {
  func.func @_triplet_kernel(%arg0: i32, %arg1: i32, %arg2: memref<128x128xf32, #tpu.memory_space<vmem>>, %arg3: memref<128x128xf32, #tpu.memory_space<vmem>>, %arg4: memref<128x1xf32, #tpu.memory_space<vmem>>, %arg5: memref<1x128xf32, #tpu.memory_space<vmem>>, %arg6: memref<128x1xi32, #tpu.memory_space<vmem>>, %arg7: memref<1x128xi32, #tpu.memory_space<vmem>>, %arg8: memref<8x128xf32, #tpu.memory_space<vmem>>, %arg9: memref<128x1xf32, #tpu.memory_space<vmem>>, %arg10: memref<128x1xf32, #tpu.memory_space<vmem>>) attributes {dimension_semantics = [#tpu.dimension_semantics<parallel>, #tpu.dimension_semantics<arbitrary>], iteration_bounds = array<i64: 1, 1>, scalar_prefetch = 0 : i64, scratch_operands = 2 : i64, tpu.core_type = #tpu.core_type<tc>, window_params = [{transform_indices = @transform_0, window_bounds = array<i64: 128, 128>}, {transform_indices = @transform_1, window_bounds = array<i64: 128, 128>}, {transform_indices = @transform_2, window_bounds = array<i64: 128, 1>}, {transform_indices = @transform_3, window_bounds = array<i64: 1, 128>}, {transform_indices = @transform_4, window_bounds = array<i64: 128, 1>}, {transform_indices = @transform_5, window_bounds = array<i64: 1, 128>}, {transform_indices = @transform_6, window_bounds = array<i64: 8, 128>}]} {
    %c0_i32 = arith.constant 0 : i32
    %0 = arith.cmpi eq, %arg1, %c0_i32 : i32
    %1 = arith.extui %0 : i1 to i32
    %c0_i32_0 = arith.constant 0 : i32
    %2 = arith.cmpi ne, %1, %c0_i32_0 : i32
    scf.if %2 {
      %cst_28 = arith.constant -1.000000e+30 : f32
      %37 = vector.broadcast %cst_28 : f32 to vector<128x1xf32>
      %c0_29 = arith.constant 0 : index
      %c0_30 = arith.constant 0 : index
      %38 = vector.load %arg9[%c0_29, %c0_30] : memref<128x1xf32, #tpu.memory_space<vmem>>, vector<128x1xf32>
      tpu.vector_store %arg9[%c0_29, %c0_30], %37 {strides = array<i32>} : memref<128x1xf32, #tpu.memory_space<vmem>>, vector<128x1xf32>,
      %cst_31 = arith.constant 1.000000e+30 : f32
      %39 = vector.broadcast %cst_31 : f32 to vector<128x1xf32>
      %c0_32 = arith.constant 0 : index
      %c0_33 = arith.constant 0 : index
      %40 = vector.load %arg10[%c0_32, %c0_33] : memref<128x1xf32, #tpu.memory_space<vmem>>, vector<128x1xf32>
      tpu.vector_store %arg10[%c0_32, %c0_33], %39 {strides = array<i32>} : memref<128x1xf32, #tpu.memory_space<vmem>>, vector<128x1xf32>,
    } else {
    }
    %c0 = arith.constant 0 : index
    %c0_1 = arith.constant 0 : index
    %3 = vector.load %arg2[%c0, %c0_1] : memref<128x128xf32, #tpu.memory_space<vmem>>, vector<128x128xf32>
    %c0_2 = arith.constant 0 : index
    %c0_3 = arith.constant 0 : index
    %4 = vector.load %arg3[%c0_2, %c0_3] : memref<128x128xf32, #tpu.memory_space<vmem>>, vector<128x128xf32>
    %cst = arith.constant dense<0.000000e+00> : vector<128x128xf32>
    %5 = tpu.matmul %3, %4, %cst {dimension_numbers = #tpu.dot_dimension_numbers<[1], [1], [0], [0], [0, 0, 1, 0], [], []>} : vector<128x128xf32>, vector<128x128xf32>, vector<128x128xf32> -> vector<128x128xf32>
    %c0_4 = arith.constant 0 : index
    %c0_5 = arith.constant 0 : index
    %6 = vector.load %arg4[%c0_4, %c0_5] : memref<128x1xf32, #tpu.memory_space<vmem>>, vector<128x1xf32>
    %c0_6 = arith.constant 0 : index
    %c0_7 = arith.constant 0 : index
    %7 = vector.load %arg5[%c0_6, %c0_7] : memref<1x128xf32, #tpu.memory_space<vmem>>, vector<1x128xf32>
    %8 = vector.broadcast %6 : vector<128x1xf32> to vector<128x128xf32>
    %9 = vector.broadcast %7 : vector<1x128xf32> to vector<128x128xf32>
    %10 = arith.addf %8, %9 : vector<128x128xf32>
    %cst_8 = arith.constant 2.000000e+00 : f32
    %11 = vector.broadcast %cst_8 : f32 to vector<128x128xf32>
    %12 = arith.mulf %11, %5 : vector<128x128xf32>
    %13 = arith.subf %10, %12 : vector<128x128xf32>
    %c0_9 = arith.constant 0 : index
    %c0_10 = arith.constant 0 : index
    %14 = vector.load %arg6[%c0_9, %c0_10] : memref<128x1xi32, #tpu.memory_space<vmem>>, vector<128x1xi32>
    %c0_11 = arith.constant 0 : index
    %c0_12 = arith.constant 0 : index
    %15 = vector.load %arg7[%c0_11, %c0_12] : memref<1x128xi32, #tpu.memory_space<vmem>>, vector<1x128xi32>
    %16 = vector.broadcast %14 : vector<128x1xi32> to vector<128x128xi32>
    %17 = vector.broadcast %15 : vector<1x128xi32> to vector<128x128xi32>
    %18 = arith.cmpi eq, %16, %17 : vector<128x128xi32>
    %c0_13 = arith.constant 0 : index
    %c0_14 = arith.constant 0 : index
    %19 = vector.load %arg9[%c0_13, %c0_14] : memref<128x1xf32, #tpu.memory_space<vmem>>, vector<128x1xf32>
    %cst_15 = arith.constant 0.000000e+00 : f32
    %cst_16 = arith.constant 1.000000e+30 : f32
    %20 = arith.subf %cst_15, %cst_16 : f32
    %21 = vector.broadcast %20 : f32 to vector<128x128xf32>
    %22 = arith.select %18, %13, %21 : vector<128x128xi1>, vector<128x128xf32>
    %cst_17 = arith.constant dense<0xFF800000> : vector<128xf32>
    %23 = vector.multi_reduction <maximumf>, %22, %cst_17 [1] : vector<128x128xf32> to vector<128xf32>
    %24 = vector.shape_cast %23 : vector<128xf32> to vector<128x1xf32>
    %25 = arith.maximumf %19, %24 : vector<128x1xf32>
    %c0_18 = arith.constant 0 : index
    %c0_19 = arith.constant 0 : index
    %26 = vector.load %arg9[%c0_18, %c0_19] : memref<128x1xf32, #tpu.memory_space<vmem>>, vector<128x1xf32>
    tpu.vector_store %arg9[%c0_18, %c0_19], %25 {strides = array<i32>} : memref<128x1xf32, #tpu.memory_space<vmem>>, vector<128x1xf32>,
    %c0_20 = arith.constant 0 : index
    %c0_21 = arith.constant 0 : index
    %27 = vector.load %arg10[%c0_20, %c0_21] : memref<128x1xf32, #tpu.memory_space<vmem>>, vector<128x1xf32>
    %cst_22 = arith.constant 1.000000e+30 : f32
    %28 = vector.broadcast %cst_22 : f32 to vector<128x128xf32>
    %29 = arith.select %18, %28, %13 : vector<128x128xi1>, vector<128x128xf32>
    %cst_23 = arith.constant dense<0x7F800000> : vector<128xf32>
    %30 = vector.multi_reduction <minimumf>, %29, %cst_23 [1] : vector<128x128xf32> to vector<128xf32>
    %31 = vector.shape_cast %30 : vector<128xf32> to vector<128x1xf32>
    %32 = arith.minimumf %27, %31 : vector<128x1xf32>
    %c0_24 = arith.constant 0 : index
    %c0_25 = arith.constant 0 : index
    %33 = vector.load %arg10[%c0_24, %c0_25] : memref<128x1xf32, #tpu.memory_space<vmem>>, vector<128x1xf32>
    tpu.vector_store %arg10[%c0_24, %c0_25], %32 {strides = array<i32>} : memref<128x1xf32, #tpu.memory_space<vmem>>, vector<128x1xf32>,
    %c0_i32_26 = arith.constant 0 : i32
    %34 = arith.cmpi eq, %arg1, %c0_i32_26 : i32
    %35 = arith.extui %34 : i1 to i32
    %c0_i32_27 = arith.constant 0 : i32
    %36 = arith.cmpi ne, %35, %c0_i32_27 : i32
    scf.if %36 {
      %c0_28 = arith.constant 0 : index
      %c0_29 = arith.constant 0 : index
      %37 = vector.load %arg9[%c0_28, %c0_29] : memref<128x1xf32, #tpu.memory_space<vmem>>, vector<128x1xf32>
      %cst_30 = arith.constant 9.99999996E-13 : f32
      %38 = vector.broadcast %cst_30 : f32 to vector<128x1xf32>
      %39 = arith.maximumf %37, %38 : vector<128x1xf32>
      %40 = math.sqrt %39 : vector<128x1xf32>
      %c0_31 = arith.constant 0 : index
      %c0_32 = arith.constant 0 : index
      %41 = vector.load %arg10[%c0_31, %c0_32] : memref<128x1xf32, #tpu.memory_space<vmem>>, vector<128x1xf32>
      %cst_33 = arith.constant 9.99999996E-13 : f32
      %42 = vector.broadcast %cst_33 : f32 to vector<128x1xf32>
      %43 = arith.maximumf %41, %42 : vector<128x1xf32>
      %44 = math.sqrt %43 : vector<128x1xf32>
      %c128_i32 = arith.constant 128 : i32
      %45 = arith.muli %arg0, %c128_i32 : i32
      %46 = tpu.iota {dimensions = array<i32: 0>} : vector<128x1xi32>
      %47 = vector.broadcast %45 : i32 to vector<128x1xi32>
      %48 = arith.addi %47, %46 : vector<128x1xi32>
      %c8_i32 = arith.constant 8 : i32
      %49 = vector.broadcast %c8_i32 : i32 to vector<128x1xi32>
      %50 = arith.cmpi slt, %48, %49 : vector<128x1xi32>
      %51 = arith.subf %40, %44 : vector<128x1xf32>
      %cst_34 = arith.constant 3.000000e-01 : f32
      %52 = vector.broadcast %cst_34 : f32 to vector<128x1xf32>
      %53 = arith.addf %51, %52 : vector<128x1xf32>
      %cst_35 = arith.constant 0.000000e+00 : f32
      %54 = vector.broadcast %cst_35 : f32 to vector<128x1xf32>
      %55 = arith.maximumf %53, %54 : vector<128x1xf32>
      %cst_36 = arith.constant 0.000000e+00 : f32
      %56 = vector.broadcast %cst_36 : f32 to vector<128x1xf32>
      %57 = arith.select %50, %55, %56 : vector<128x1xi1>, vector<128x1xf32>
      %58 = arith.cmpf oge, %44, %40 : vector<128x1xf32>
      %59 = arith.andi %50, %58 : vector<128x1xi1>
      %cst_37 = arith.constant 1.000000e+00 : f32
      %cst_38 = arith.constant 0.000000e+00 : f32
      %60 = vector.broadcast %cst_37 : f32 to vector<128x1xf32>
      %61 = vector.broadcast %cst_38 : f32 to vector<128x1xf32>
      %62 = arith.select %59, %60, %61 : vector<128x1xi1>, vector<128x1xf32>
      %63 = vector.shape_cast %57 : vector<128x1xf32> to vector<1x128x1xf32>
      %cst_39 = arith.constant dense<0.000000e+00> : vector<1xf32>
      %64 = vector.multi_reduction <add>, %63, %cst_39 [1, 2] : vector<1x128x1xf32> to vector<1xf32>
      %65 = vector.shape_cast %64 : vector<1xf32> to vector<1x1x1xf32>
      %66 = vector.extract %65[0, 0, 0] : f32 from vector<1x1x1xf32>
      %67 = vector.broadcast %66 : f32 to vector<1x1xf32>
      %68 = vector.shape_cast %62 : vector<128x1xf32> to vector<1x128x1xf32>
      %cst_40 = arith.constant dense<0.000000e+00> : vector<1xf32>
      %69 = vector.multi_reduction <add>, %68, %cst_40 [1, 2] : vector<1x128x1xf32> to vector<1xf32>
      %70 = vector.shape_cast %69 : vector<1xf32> to vector<1x1x1xf32>
      %71 = vector.extract %70[0, 0, 0] : f32 from vector<1x1x1xf32>
      %72 = vector.broadcast %71 : f32 to vector<1x1xf32>
      %73 = tpu.iota {dimensions = array<i32: 0>} : vector<8x128xi32>
      %74 = tpu.iota {dimensions = array<i32: 1>} : vector<8x128xi32>
      %c0_i32_41 = arith.constant 0 : i32
      %75 = vector.broadcast %c0_i32_41 : i32 to vector<8x128xi32>
      %76 = arith.cmpi eq, %73, %75 : vector<8x128xi32>
      %c0_i32_42 = arith.constant 0 : i32
      %77 = vector.broadcast %c0_i32_42 : i32 to vector<8x128xi32>
      %78 = arith.cmpi eq, %74, %77 : vector<8x128xi32>
      %79 = arith.andi %76, %78 : vector<8x128xi1>
      %c0_i32_43 = arith.constant 0 : i32
      %80 = vector.broadcast %c0_i32_43 : i32 to vector<8x128xi32>
      %81 = arith.cmpi eq, %73, %80 : vector<8x128xi32>
      %c1_i32 = arith.constant 1 : i32
      %82 = vector.broadcast %c1_i32 : i32 to vector<8x128xi32>
      %83 = arith.cmpi eq, %74, %82 : vector<8x128xi32>
      %84 = arith.andi %81, %83 : vector<8x128xi1>
      %cst_44 = arith.constant 0.000000e+00 : f32
      %85 = vector.shape_cast %72 : vector<1x1xf32> to vector<1x1xf32>
      %86 = vector.broadcast %85 : vector<1x1xf32> to vector<8x128xf32>
      %87 = vector.broadcast %cst_44 : f32 to vector<8x128xf32>
      %88 = arith.select %84, %86, %87 : vector<8x128xi1>, vector<8x128xf32>
      %89 = vector.shape_cast %67 : vector<1x1xf32> to vector<1x1xf32>
      %90 = vector.broadcast %89 : vector<1x1xf32> to vector<8x128xf32>
      %91 = arith.select %79, %90, %88 : vector<8x128xi1>, vector<8x128xf32>
      %c0_45 = arith.constant 0 : index
      %c0_46 = arith.constant 0 : index
      %92 = vector.load %arg8[%c0_45, %c0_46] : memref<8x128xf32, #tpu.memory_space<vmem>>, vector<8x128xf32>
      tpu.vector_store %arg8[%c0_45, %c0_46], %91 {strides = array<i32>} : memref<8x128xf32, #tpu.memory_space<vmem>>, vector<8x128xf32>,
    } else {
    }
    return
  }
  func.func @transform_0(%arg0: i32, %arg1: i32) -> (i32, i32) {
    %c0_i32 = arith.constant 0 : i32
    %c0_i32_0 = arith.constant 0 : i32
    return %arg0, %c0_i32 : i32, i32
  }
  func.func @transform_1(%arg0: i32, %arg1: i32) -> (i32, i32) {
    %c0_i32 = arith.constant 0 : i32
    %c0_i32_0 = arith.constant 0 : i32
    return %arg1, %c0_i32 : i32, i32
  }
  func.func @transform_2(%arg0: i32, %arg1: i32) -> (i32, i32) {
    %c0_i32 = arith.constant 0 : i32
    %c0_i32_0 = arith.constant 0 : i32
    return %arg0, %c0_i32 : i32, i32
  }
  func.func @transform_3(%arg0: i32, %arg1: i32) -> (i32, i32) {
    %c0_i32 = arith.constant 0 : i32
    %c0_i32_0 = arith.constant 0 : i32
    return %c0_i32, %arg1 : i32, i32
  }
  func.func @transform_4(%arg0: i32, %arg1: i32) -> (i32, i32) {
    %c0_i32 = arith.constant 0 : i32
    %c0_i32_0 = arith.constant 0 : i32
    return %arg0, %c0_i32 : i32, i32
  }
  func.func @transform_5(%arg0: i32, %arg1: i32) -> (i32, i32) {
    %c0_i32 = arith.constant 0 : i32
    %c0_i32_0 = arith.constant 0 : i32
    return %c0_i32, %arg1 : i32, i32
  }
  func.func @transform_6(%arg0: i32, %arg1: i32) -> (i32, i32) {
    %c0_i32 = arith.constant 0 : i32
    %c0_i32_0 = arith.constant 0 : i32
    return %arg0, %c0_i32 : i32, i32
  }
}

</mosaic_0001>

<bundles_post_ra>
// kernel: tpu_custom_call.1
= control target key start
LH: loop header
LB: loop body
LE: loop exit
PB: predicated region body
PF: predicated region fallthrough
CT: control target
= control target key end

     0   :  { %v1386_v3 = vmov 0   ;;  %s1925_s0 = inlined_call_operand.vmem [shape: f32[128,128], index: 0, kind: input, shape index: {}]   ;;  %s1926_s1 = inlined_call_operand.vmem [shape: f32[128,128], index: 1, kind: input, shape index: {}]   ;;  %s1927_s2 = inlined_call_operand.vmem [shape: f32[128,1], index: 2, kind: input, shape index: {}]   ;;  %s1928_s3 = inlined_call_operand.vmem [shape: f32[1,128], index: 3, kind: input, shape index: {}]   ;;  %s1929_s4 = inlined_call_operand.vmem [shape: s32[128,1], index: 4, kind: input, shape index: {}]   ;;  %s1930_s5 = inlined_call_operand.vmem [shape: s32[1,128], index: 5, kind: input, shape index: {}]   ;;  %s1931_s6 = inlined_call_operand.hbm [shape: f32[8,128], index: 6, kind: output, shape index: {}]  }
   0x1   :  { %v92_v0 = vld [vmem:[%s1926_s1 + $0x78] sm:$0xff]  ;;  %v91_v1 = vld [vmem:[%s1926_s1 + $0x70] sm:$0xff]  ;;  %v90_v2 = vld [vmem:[%s1926_s1 + $0x68] sm:$0xff]  ;;  %1358 = vset.pattern.permute.xlu0 %v1386_v3  ;;  %1359 = vset.pattern.permute.xlu1 %v1386_v3 }
   0x2   :  { %1261 = vmatprep.subr.mxu0 %v92_v0  ;;  %1317 = vmatprep.subr.mxu1 %v92_v0  ;;  %v238_v4 = vld [vmem:[%s1927_s2] sm:$0xff]  ;;  %v88_v9 = vld [vmem:[%s1926_s1 + $0x58] sm:$0xff]  ;;  %v239_v10 = vld [vmem:[%s1927_s2 + $0x8] sm:$0xff] }
   0x3   :  { %1262 = vmatpush3.xpose.msra.mxu0 %v92_v0  ;;  %1333 = vmatpush3.xpose.msra.mxu1 %v92_v0  ;;  %v61_v5 = vld [vmem:[%s1925_s0] sm:$0xff]  ;;  %v87_v11 = vld [vmem:[%s1926_s1 + $0x50] sm:$0xff]  ;;  %v241_v12 = vld [vmem:[%s1927_s2 + $0x18] sm:$0xff] }
   0x4   :  { %1263 = vmatprep.subr.mxu0 %v91_v1  ;;  %1318 = vmatprep.subr.mxu1 %v91_v1  ;;  %v69_v6 = vld [vmem:[%s1925_s0 + $0x40] sm:$0xff] }
   0x5   :  { %v89_v7 = vld [vmem:[%s1926_s1 + $0x60] sm:$0xff]  ;;  %257 = vperm.xlu0 %1358, %v238_v4   ;;  %1293 = vmatprep.mubr.f32.mxu0 %v61_v5 }
   0x6   :  { %1305 = vmatprep.mubr.f32.mxu1 %v69_v6  ;;  %v389_v8 = vld [vmem:[%s1929_s4] sm:$0xff] }
   0x7   :  { %1264 = vmatpush3.xpose.msra.mxu0 %v91_v1  ;;  %1334 = vmatpush3.xpose.msra.mxu1 %v91_v1 }
   0x8   :  { %1265 = vmatprep.subr.mxu0 %v90_v2  ;;  %1319 = vmatprep.subr.mxu1 %v90_v2 }
   0x9   :  { %407 = vperm.xlu0 %1358, %v389_v8  }
   0xb   :  { %1266 = vmatpush3.xpose.msra.mxu0 %v90_v2  ;;  %1335 = vmatpush3.xpose.msra.mxu1 %v90_v2 }
   0xc   :  { %1267 = vmatprep.subr.mxu0 %v89_v7  ;;  %1320 = vmatprep.subr.mxu1 %v89_v7 }
   0xd   :  { %262 = vperm.xlu0 %1358, %v239_v10  }
   0xf   :  { %1268 = vmatpush3.xpose.msra.mxu0 %v89_v7  ;;  %1336 = vmatpush3.xpose.msra.mxu1 %v89_v7 }
  0x10   :  { %1269 = vmatprep.subr.mxu0 %v88_v9  ;;  %1321 = vmatprep.subr.mxu1 %v88_v9 }
  0x11   :  { %11 = vsyncpa [#allocation5], 0  ;;  %v86_v13 = vld [vmem:[%s1926_s1 + $0x48] sm:$0xff]  ;;  %272 = vperm.xlu0 %1358, %v241_v12   ;;  %v242_v14 = vld [vmem:[%s1927_s2 + $0x20] sm:$0xff]  ;;  %vm28_vm1 = vcmask 7168   ;;  %s1390_s26 = smov [#allocation4]  }
  0x12   :  { %v85_v15 = vld [vmem:[%s1926_s1 + $0x40] sm:$0xff]  ;;  %v243_v16 = vld [vmem:[%s1927_s2 + $0x28] sm:$0xff]  ;;  %v84_v17 = vld [vmem:[%s1926_s1 + $0x38] sm:$0xff]  ;;  %v1387_v62 = vmov -1e+30  }
  0x13   :  { %1270 = vmatpush3.xpose.msra.mxu0 %v88_v9  ;;  %1337 = vmatpush3.xpose.msra.mxu1 %v88_v9  ;;  %v244_v18 = vld [vmem:[%s1927_s2 + $0x30] sm:$0xff]  ;;  %v246_v20 = vld [vmem:[%s1927_s2 + $0x40] sm:$0xff]  ;;  %v82_v21 = vld [vmem:[%s1926_s1 + $0x28] sm:$0xff]  ;;  %29 = vst.msk [vmem:[#allocation2] sm:$0xff] %vm28_vm1, %v1387_v62  ;;  %v1388_v0 = vmov 1e+30  }
  0x14   :  { %1271 = vmatprep.subr.mxu0 %v87_v11  ;;  %1322 = vmatprep.subr.mxu1 %v87_v11  ;;  %v83_v19 = vld [vmem:[%s1926_s1 + $0x30] sm:$0xff]  ;;  %v81_v23 = vld [vmem:[%s1926_s1 + $0x20] sm:$0xff]  ;;  %v80_v25 = vld [vmem:[%s1926_s1 + $0x18] sm:$0xff]  ;;  %30 = vst.msk [vmem:[#allocation2 + $0x8] sm:$0xff] %vm28_vm1, %v1387_v62 }
  0x15   :  { %277 = vperm.xlu0 %1358, %v242_v14   ;;  %v248_v22 = vld [vmem:[%s1927_s2 + $0x50] sm:$0xff]  ;;  %v250_v24 = vld [vmem:[%s1927_s2 + $0x60] sm:$0xff]  ;;  %v390_v28 = vld [vmem:[%s1929_s4 + $0x8] sm:$0xff]  ;;  %31 = vst.msk [vmem:[#allocation2 + $0x10] sm:$0xff] %vm28_vm1, %v1387_v62 }
  0x16   :  { %v252_v26 = vld [vmem:[%s1927_s2 + $0x70] sm:$0xff]  ;;  %v78_v29 = vld [vmem:[%s1926_s1 + $0x8] sm:$0xff]  ;;  %v392_v30 = vld [vmem:[%s1929_s4 + $0x18] sm:$0xff]  ;;  %32 = vst.msk [vmem:[#allocation2 + $0x18] sm:$0xff] %vm28_vm1, %v1387_v62 }
  0x17   :  { %1272 = vmatpush3.xpose.msra.mxu0 %v87_v11  ;;  %1338 = vmatpush3.xpose.msra.mxu1 %v87_v11  ;;  %v79_v27 = vld [vmem:[%s1926_s1 + $0x10] sm:$0xff]  ;;  %v77_v31 = vld [vmem:[%s1926_s1] sm:$0xff]  ;;  %v394_v32 = vld [vmem:[%s1929_s4 + $0x28] sm:$0xff]  ;;  %33 = vst.msk [vmem:[#allocation2 + $0x20] sm:$0xff] %vm28_vm1, %v1387_v62 }
  0x18   :  { %1273 = vmatprep.subr.mxu0 %v86_v13  ;;  %1323 = vmatprep.subr.mxu1 %v86_v13  ;;  %v396_v33 = vld [vmem:[%s1929_s4 + $0x38] sm:$0xff]  ;;  %v62_v34 = vld [vmem:[%s1925_s0 + $0x8] sm:$0xff]  ;;  %v63_v36 = vld [vmem:[%s1925_s0 + $0x10] sm:$0xff]  ;;  %34 = vst.msk [vmem:[#allocation2 + $0x28] sm:$0xff] %vm28_vm1, %v1387_v62 }
  0x19   :  { %282 = vperm.xlu0 %1358, %v243_v16   ;;  %v70_v35 = vld [vmem:[%s1925_s0 + $0x48] sm:$0xff]  ;;  %v71_v37 = vld [vmem:[%s1925_s0 + $0x50] sm:$0xff]  ;;  %v64_v39 = vld [vmem:[%s1925_s0 + $0x18] sm:$0xff]  ;;  %35 = vst.msk [vmem:[#allocation2 + $0x30] sm:$0xff] %vm28_vm1, %v1387_v62 }
  0x1a   :  { %v398_v38 = vld [vmem:[%s1929_s4 + $0x48] sm:$0xff]  ;;  %v72_v40 = vld [vmem:[%s1925_s0 + $0x58] sm:$0xff]  ;;  %v65_v41 = vld [vmem:[%s1925_s0 + $0x20] sm:$0xff]  ;;  %36 = vst.msk [vmem:[#allocation2 + $0x38] sm:$0xff] %vm28_vm1, %v1387_v62 }
  0x1b   :  { %1274 = vmatpush3.xpose.msra.mxu0 %v86_v13  ;;  %1339 = vmatpush3.xpose.msra.mxu1 %v86_v13  ;;  %v73_v42 = vld [vmem:[%s1925_s0 + $0x60] sm:$0xff]  ;;  %v400_v43 = vld [vmem:[%s1929_s4 + $0x58] sm:$0xff]  ;;  %v66_v44 = vld [vmem:[%s1925_s0 + $0x28] sm:$0xff]  ;;  %37 = vst.msk [vmem:[#allocation2 + $0x40] sm:$0xff] %vm28_vm1, %v1387_v62 }
  0x1c   :  { %1275 = vmatprep.subr.mxu0 %v85_v15  ;;  %1324 = vmatprep.subr.mxu1 %v85_v15  ;;  %v74_v45 = vld [vmem:[%s1925_s0 + $0x68] sm:$0xff]  ;;  %v67_v46 = vld [vmem:[%s1925_s0 + $0x30] sm:$0xff]  ;;  %v68_v49 = vld [vmem:[%s1925_s0 + $0x38] sm:$0xff]  ;;  %38 = vst.msk [vmem:[#allocation2 + $0x48] sm:$0xff] %vm28_vm1, %v1387_v62 }
  0x1d   :  { %287 = vperm.xlu0 %1358, %v244_v18   ;;  %v75_v47 = vld [vmem:[%s1925_s0 + $0x70] sm:$0xff]  ;;  %v402_v48 = vld [vmem:[%s1929_s4 + $0x68] sm:$0xff]  ;;  %v76_v50 = vld [vmem:[%s1925_s0 + $0x78] sm:$0xff]  ;;  %39 = vst.msk [vmem:[#allocation2 + $0x50] sm:$0xff] %vm28_vm1, %v1387_v62  ;;  %s1219_s0 = sshll.u32 %s1390_s26, 4  ;;  %s1220_s0 = int_to_ptr.vmem [resolvable:$true] %s1219_s0 }
  0x1e   :  { %v404_v51 = vld [vmem:[%s1929_s4 + $0x78] sm:$0xff]  ;;  %v1582_v52 = vld [vmem:[%s1928_s3] ss:$0 sm:$0xff]  ;;  %40 = vst.msk [vmem:[#allocation2 + $0x58] sm:$0xff] %vm28_vm1, %v1387_v62  ;;  %41 = vst.msk [vmem:[#allocation2 + $0x60] sm:$0xff] %vm28_vm1, %v1387_v62  ;;  %s1364_s3 = scalar_lea.vmem %s1220_s0, 128  ;;  %p1369_p1 = scmp.lt.s32.totalorder %s1220_s0, %s1220_s0 }
  0x1f   :  { %1276 = vmatpush3.xpose.msra.mxu0 %v85_v15  ;;  %1340 = vmatpush3.xpose.msra.mxu1 %v85_v15  ;;  %v1590_v57 = vld [vmem:[%s1930_s5] ss:$0 sm:$0xff]  ;;  %42 = vst.msk [vmem:[#allocation2 + $0x68] sm:$0xff] %vm28_vm1, %v1387_v62  ;;  %43 = vst.msk [vmem:[#allocation2 + $0x70] sm:$0xff] %vm28_vm1, %v1387_v62  ;;  %v240_v1 = vld [vmem:[%s1927_s2 + $0x10] sm:$0xff]  ;;  %p1365_p0 = scmp.ne.s32.totalorder %s1220_s0, %s1364_s3  ;;  %p1370_p2 = scmp.lt.s32.totalorder %s1364_s3, %s1364_s3 }
  0x20   :  { %1277 = vmatprep.subr.mxu0 %v84_v17  ;;  %1325 = vmatprep.subr.mxu1 %v84_v17  ;;  %44 = vst.msk [vmem:[#allocation2 + $0x78] sm:$0xff] %vm28_vm1, %v1387_v62  ;;  %45 = vst.msk [vmem:[#allocation3] sm:$0xff] %vm28_vm1, %v1388_v0  ;;  %v245_v2 = vld [vmem:[%s1927_s2 + $0x38] sm:$0xff]  ;;  %v247_v3 = vld [vmem:[%s1927_s2 + $0x48] sm:$0xff] }
  0x21   :  { %297 = vperm.xlu0 %1358, %v246_v20   ;;  %46 = vst.msk [vmem:[#allocation3 + $0x8] sm:$0xff] %vm28_vm1, %v1388_v0  ;;  %47 = vst.msk [vmem:[#allocation3 + $0x10] sm:$0xff] %vm28_vm1, %v1388_v0  ;;  %v249_v4 = vld [vmem:[%s1927_s2 + $0x58] sm:$0xff]  ;;  %v251_v5 = vld [vmem:[%s1927_s2 + $0x68] sm:$0xff]  ;;  %p1371_p3 = por %p1370_p2, %p1369_p1 }
  0x22   :  { %48 = vst.msk [vmem:[#allocation3 + $0x18] sm:$0xff] %vm28_vm1, %v1388_v0  ;;  %49 = vst.msk [vmem:[#allocation3 + $0x20] sm:$0xff] %vm28_vm1, %v1388_v0  ;;  %v253_v6 = vld [vmem:[%s1927_s2 + $0x78] sm:$0xff]  ;;  %v391_v7 = vld [vmem:[%s1929_s4 + $0x10] sm:$0xff] }
  0x23   :  { %1278 = vmatpush3.xpose.msra.mxu0 %v84_v17  ;;  %1341 = vmatpush3.xpose.msra.mxu1 %v84_v17  ;;  %50 = vst.msk [vmem:[#allocation3 + $0x28] sm:$0xff] %vm28_vm1, %v1388_v0  ;;  %51 = vst.msk [vmem:[#allocation3 + $0x30] sm:$0xff] %vm28_vm1, %v1388_v0  ;;  %v393_v8 = vld [vmem:[%s1929_s4 + $0x20] sm:$0xff]  ;;  %v395_v9 = vld [vmem:[%s1929_s4 + $0x30] sm:$0xff]  ;;  %p1372_p4 = pnand %p1371_p3, %p1365_p0 }
  0x24   :  { %1279 = vmatprep.subr.mxu0 %v83_v19  ;;  %1326 = vmatprep.subr.mxu1 %v83_v19  ;;  %52 = vst.msk [vmem:[#allocation3 + $0x38] sm:$0xff] %vm28_vm1, %v1388_v0  ;;  %53 = vst.msk [vmem:[#allocation3 + $0x40] sm:$0xff] %vm28_vm1, %v1388_v0  ;;  %v397_v10 = vld [vmem:[%s1929_s4 + $0x40] sm:$0xff]  ;;  %v399_v11 = vld [vmem:[%s1929_s4 + $0x50] sm:$0xff] }
  0x25   :  { %307 = vperm.xlu0 %1358, %v248_v22   ;;  %54 = vst.msk [vmem:[#allocation3 + $0x48] sm:$0xff] %vm28_vm1, %v1388_v0  ;;  %55 = vst.msk [vmem:[#allocation3 + $0x50] sm:$0xff] %vm28_vm1, %v1388_v0  ;;  %v401_v12 = vld [vmem:[%s1929_s4 + $0x60] sm:$0xff]  ;;  %v403_v13 = vld [vmem:[%s1929_s4 + $0x70] sm:$0xff] }
  0x26   :  { %56 = vst.msk [vmem:[#allocation3 + $0x58] sm:$0xff] %vm28_vm1, %v1388_v0  ;;  %57 = vst.msk [vmem:[#allocation3 + $0x60] sm:$0xff] %vm28_vm1, %v1388_v0 }
  0x27   :  { %1280 = vmatpush3.xpose.msra.mxu0 %v83_v19  ;;  %1342 = vmatpush3.xpose.msra.mxu1 %v83_v19  ;;  %58 = vst.msk [vmem:[#allocation3 + $0x68] sm:$0xff] %vm28_vm1, %v1388_v0  ;;  %59 = vst.msk [vmem:[#allocation3 + $0x70] sm:$0xff] %vm28_vm1, %v1388_v0  ;;  %v474_v19 = vld [vmem:[#allocation2] sm:$0xff] }
  0x28   :  { %1281 = vmatprep.subr.mxu0 %v82_v21  ;;  %1327 = vmatprep.subr.mxu1 %v82_v21  ;;  %60 = vst.msk [vmem:[#allocation3 + $0x78] sm:$0xff] %vm28_vm1, %v1388_v0 }
  0x29   :  { %317 = vperm.xlu0 %1358, %v250_v24  }
  0x2b   :  { %1282 = vmatpush3.xpose.msra.mxu0 %v82_v21  ;;  %1343 = vmatpush3.xpose.msra.mxu1 %v82_v21 }
  0x2c   :  { %1283 = vmatprep.subr.mxu0 %v81_v23  ;;  %1328 = vmatprep.subr.mxu1 %v81_v23 }
  0x2d   :  { %327 = vperm.xlu0 %1358, %v252_v26  }
  0x2f   :  { %1284 = vmatpush3.xpose.msra.mxu0 %v81_v23  ;;  %1344 = vmatpush3.xpose.msra.mxu1 %v81_v23  ;;  %v571_v23 = vld [vmem:[#allocation3] sm:$0xff] }
  0x30   :  { %1285 = vmatprep.subr.mxu0 %v80_v25  ;;  %1329 = vmatprep.subr.mxu1 %v80_v25 }
  0x31   :  { %410 = vperm.xlu0 %1358, %v390_v28  }
  0x33   :  { %1286 = vmatpush3.xpose.msra.mxu0 %v80_v25  ;;  %1345 = vmatpush3.xpose.msra.mxu1 %v80_v25 }
  0x34   :  { %1287 = vmatprep.subr.mxu0 %v79_v27  ;;  %1330 = vmatprep.subr.mxu1 %v79_v27 }
  0x35   :  { %416 = vperm.xlu0 %1358, %v392_v30  }
  0x37   :  { %1288 = vmatpush3.xpose.msra.mxu0 %v79_v27  ;;  %1346 = vmatpush3.xpose.msra.mxu1 %v79_v27 }
  0x38   :  { %1289 = vmatprep.subr.mxu0 %v78_v29  ;;  %1331 = vmatprep.subr.mxu1 %v78_v29 }
  0x39   :  { %422 = vperm.xlu0 %1358, %v394_v32  }
  0x3b   :  { %1290 = vmatpush3.xpose.msra.mxu0 %v78_v29  ;;  %1347 = vmatpush3.xpose.msra.mxu1 %v78_v29 }
  0x3c   :  { %1291 = vmatprep.subr.mxu0 %v77_v31  ;;  %1332 = vmatprep.subr.mxu1 %v77_v31 }
  0x3d   :  { %428 = vperm.xlu0 %1358, %v396_v33  }
  0x3f   :  { %1292 = vmatpush3.xpose.msra.mxu0 %v77_v31  ;;  %1348 = vmatpush3.xpose.msra.mxu1 %v77_v31 }
  0x41   :  { %434 = vperm.xlu0 %1358, %v398_v38  }
  0x42   :  { %1294 = vmatmul.mubr.f32.vlgmr.msra.gmra.mxu0 %v62_v34  ;;  %1306 = vmatmul.mubr.f32.vlgmr.msra.gmra.mxu1 %v70_v35 }
  0x43   :  { %1296 = vmatprep.mubr.f32.mxu0 %v63_v36  ;;  %1308 = vmatprep.mubr.f32.mxu1 %v71_v37 }
  0x45   :  { %440 = vperm.xlu0 %1358, %v400_v43  }
  0x46   :  { %1297 = vmatmul.mubr.f32.gmra.mxu0 %v64_v39  ;;  %1309 = vmatmul.mubr.f32.gmra.mxu1 %v72_v40 }
  0x47   :  { %1299 = vmatprep.mubr.f32.mxu0 %v65_v41  ;;  %1311 = vmatprep.mubr.f32.mxu1 %v73_v42 }
  0x49   :  { %446 = vperm.xlu0 %1358, %v402_v48  }
  0x4a   :  { %1300 = vmatmul.mubr.f32.gmra.mxu0 %v66_v44  ;;  %1312 = vmatmul.mubr.f32.gmra.mxu1 %v74_v45 }
  0x4b   :  { %1302 = vmatprep.mubr.f32.mxu0 %v67_v46  ;;  %1314 = vmatprep.mubr.f32.mxu1 %v75_v47 }
  0x4d   :  { %452 = vperm.xlu0 %1358, %v404_v51  }
  0x4e   :  { %1303 = vmatmul.mubr.f32.gmra.mxu0 %v68_v49  ;;  %1315 = vmatmul.mubr.f32.gmra.mxu1 %v76_v50 }
  0x80   :  { %v258_v53 = vpop.permute.xlu0 %257 }
  0x81   :  { %v341_v55 = vadd.f32 %v1582_v52, %v258_v53 }
  0x84   :  { %v408_v59 = vpop.permute.xlu0 %407 }
  0x85   :  { %vm458_vm0 = vcmp.eq.s32.totalorder %v408_v59, %v1590_v57 }
  0x88   :  { %v263_v14 = vpop.permute.xlu0 %262 }
  0x89   :  { %v342_v46 = vadd.f32 %v1582_v52, %v263_v14 }
  0x8c   :  { %v1668_v15 = vpop.permute.xlu0 %272 }
  0x90   :  { %v1670_v16 = vpop.permute.xlu0 %277 }
  0x94   :  { %v1672_v17 = vpop.permute.xlu0 %282 }
  0x98   :  { %v1674_v18 = vpop.permute.xlu0 %287 }
  0x9c   :  { %v1676_v20 = vpop.permute.xlu0 %297 }
  0xa0   :  { %v1679_v25 = vpop.permute.xlu0 %307 }
  0xa4   :  { %v1682_v29 = vpop.permute.xlu0 %317 }
  0xa8   :  { %v1688_v35 = vpop.permute.xlu0 %327 }
  0xac   :  { %v1692_v37 = vpop.permute.xlu0 %410 }
  0xad   :  { %vm459_vm7 = vcmp.eq.s32.totalorder %v1692_v37, %v1590_v57 }
  0xb0   :  { %v1698_v44 = vpop.permute.xlu0 %416 }
  0xb1   :  { %vm461_vm9 = vcmp.eq.s32.totalorder %v1698_v44, %v1590_v57 }
 0x102   :  { %v1584_v54 = vpop.f32.mrf.mxu0  ;;  %v1701_v47 = vpop.f32.mrf.mxu1 }
 0x103   :  { %v358_v50 = vmul.f32 2.0, %v1584_v54  ;;  %v1389_v54 = vmov 0.0  }
 0x104   :  { %v159_v56 = vpop.f32.mrf.mxu0  ;;  %v199_v62 = vpop.f32.mrf.mxu1 }
 0x105   :  { %v357_v58 = vmul.f32 2.0, %v159_v56 }
 0x106   :  { %v1298_v38 = vpop.f32.mrf.mxu0 }
 0x107   :  { %v373_v60 = vsub.f32 %v341_v55, %v357_v58  ;;  %v360_v0 = vmul.f32 2.0, %v1298_v38 }
 0x108   :  { %v169_v42 = vpop.f32.mrf.mxu0 }
 0x109   :  { %v490_v61 = vsel %vm458_vm0, %v373_v60, -1e+30  ;;  %v587_v63 = vsel %vm458_vm0, 1e+30, %v373_v60 }
 0x10a   :  { %506 = vmax.xlane.f32.xlu1 %v490_v61  ;;  %v1301_v51 = vpop.f32.mrf.mxu0  ;;  %v1706_v61 = vpop.permute.xlu0 %422 }
 0x10b   :  { %vm463_vm11 = vcmp.eq.s32.totalorder %v1706_v61, %v1590_v57 }
 0x10e   :  { %603 = vmin.xlane.f32.xlu1 %v587_v63 }
 0x11f   :  { %267 = vperm.xlu1 %1359, %v240_v1   ;;  %v179_v1 = vpop.f32.mrf.mxu0 }
 0x123   :  { %292 = vperm.xlu1 %1359, %v245_v2  }
 0x127   :  { %302 = vperm.xlu1 %1359, %v247_v3  }
 0x12b   :  { %312 = vperm.xlu1 %1359, %v249_v4  }
 0x12f   :  { %322 = vperm.xlu1 %1359, %v251_v5   ;;  %v1711_v5 = vsub.f32 %v342_v46, %v358_v50  ;;  %v366_v46 = vmul.f32 2.0, %v1701_v47  ;;  %v365_v47 = vmul.f32 2.0, %v199_v62 }
 0x133   :  { %332 = vperm.xlu1 %1359, %v253_v6  }
 0x137   :  { %413 = vperm.xlu1 %1359, %v391_v7   ;;  %v344_v7 = vadd.f32 %v1582_v52, %v1668_v15  ;;  %v491_v15 = vsel %vm459_vm7, %v1711_v5, -1e+30 }
 0x139   :  { %v1720_v14 = vsub.f32 %v344_v7, %v360_v0 }
 0x13b   :  { %419 = vperm.xlu1 %1359, %v393_v8   ;;  %v1310_v8 = vpop.f32.mrf.mxu1 }
 0x13f   :  { %425 = vperm.xlu1 %1359, %v395_v9   ;;  %v359_v9 = vmul.f32 2.0, %v169_v42 }
 0x143   :  { %431 = vperm.xlu1 %1359, %v397_v10  }
 0x147   :  { %437 = vperm.xlu1 %1359, %v399_v11  }
 0x14b   :  { %443 = vperm.xlu1 %1359, %v401_v12   ;;  %v1304_v12 = vpop.f32.mrf.mxu0 }
 0x14f   :  { %449 = vperm.xlu1 %1359, %v403_v13  }
 0x193   :  { %v507_v21 = vpop.xlane.xlu1 %506 }
 0x194   :  { %v538_v22 = vmax.f32 %v474_v19, %v507_v21  ;;  %v1722_v19 = vpop.permute.xlu0 %428  ;;  %v362_v21 = vmul.f32 2.0, %v1301_v51 }
 0x195   :  { %vm465_vm13 = vcmp.eq.s32.totalorder %v1722_v19, %v1590_v57 }
 0x196   :  { %555 = vst.msk [vmem:[#allocation2] sm:$0xff] %vm28_vm1, %v538_v22 }
 0x197   :  { %v604_v24 = vpop.xlane.xlu1 %603 }
 0x198   :  { %v635_v26 = vmin.f32 %v571_v23, %v604_v24  ;;  %v346_v23 = vadd.f32 %v1582_v52, %v1672_v17  ;;  %v361_v24 = vmul.f32 2.0, %v179_v1 }
 0x19a   :  { %651 = vst.msk [vmem:[#allocation3] sm:$0xff] %vm28_vm1, %v635_v26 }
 0x19b   :  { %v268_v27 = vpop.permute.xlu1 %267 }
 0x19c   :  { %v343_v10 = vadd.f32 %v1582_v52, %v268_v27  ;;  %v345_v27 = vadd.f32 %v1582_v52, %v1670_v16  ;;  %v1755_v16 = vpop.permute.xlu0 %434 }
 0x19d   :  { %v670_v28 = vld [vmem:[#allocation2] sm:$0xff]  ;;  %vm467_vm15 = vcmp.eq.s32.totalorder %v1755_v16, %v1590_v57 }
 0x19e   :  { %v686_v30 = vmax.f32 %v670_v28, 1e-12  ;;  %v1735_v26 = vsub.f32 %v343_v10, %v359_v9  ;;  %v209_v28 = vpop.f32.mrf.mxu1 }
 0x19f   :  { %v1684_v31 = vpop.permute.xlu1 %292  ;;  %v367_v1 = vmul.f32 2.0, %v209_v28 }
 0x1a0   :  { %1360 = vrsqrt.f32 %v686_v30  ;;  %vm704_vm2 = vcmp.eq.f32.partialorder %v686_v30, inf  ;;  %v707_v55 = vand.u32 2147483648, %v686_v30  ;;  %vm706_vm4 = vcmp.eq.f32.partialorder %v686_v30, 0.0 }
 0x1a1   :  { %v814_v32 = vld [vmem:[#allocation3] sm:$0xff]  ;;  %v348_v17 = vadd.f32 %v1582_v52, %v1684_v31  ;;  %v347_v31 = vadd.f32 %v1582_v52, %v1674_v18 }
 0x1a2   :  { %v830_v33 = vmax.f32 %v814_v32, 1e-12  ;;  %v493_v32 = vsel %vm461_vm9, %v1720_v14, -1e+30 }
 0x1a3   :  { %v1686_v34 = vpop.permute.xlu1 %302 }
 0x1a4   :  { %1362 = vrsqrt.f32 %v830_v33  ;;  %vm848_vm3 = vcmp.eq.f32.partialorder %v830_v33, inf  ;;  %v851_v56 = vand.u32 2147483648, %v830_v33  ;;  %vm850_vm5 = vcmp.eq.f32.partialorder %v830_v33, 0.0 }
 0x1a7   :  { %v1690_v36 = vpop.permute.xlu1 %312 }
 0x1ab   :  { %v1694_v39 = vpop.permute.xlu1 %322 }
 0x1ad   :  { %v1361_v40 = vpop.eup %1360 }
 0x1ae   :  { %v703_v41 = vmul.f32 %v1361_v40, %v686_v30 }
 0x1af   :  { %v1696_v43 = vpop.permute.xlu1 %332 }
 0x1b0   :  { %v705_v48 = vsel %vm704_vm2, %v686_v30, %v703_v41  ;;  %v189_v30 = vpop.f32.mrf.mxu0  ;;  %v1751_v41 = vsub.f32 %v346_v23, %v362_v21 }
 0x1b1   :  { %v1363_v45 = vpop.eup %1362  ;;  %v708_v59 = vsel %vm706_vm4, %v707_v55, %v705_v48  ;;  %v363_v42 = vmul.f32 2.0, %v189_v30  ;;  %v1313_v48 = vpop.f32.mrf.mxu1 }
 0x1b2   :  { %v847_v49 = vmul.f32 %v1363_v45, %v830_v33  ;;  %v1757_v45 = vsub.f32 %v345_v27, %v361_v24  ;;  %v495_v50 = vsel %vm463_vm11, %v1751_v41, -1e+30 }
 0x1b3   :  { %v1704_v53 = vpop.permute.xlu1 %413  ;;  %v1780_v55 = vsub.f32 %v347_v31, %v363_v42 }
 0x1b4   :  { %v849_v58 = vsel %vm848_vm3, %v830_v33, %v847_v49  ;;  %vm460_vm8 = vcmp.eq.s32.totalorder %v1704_v53, %v1590_v57  ;;  %v364_v33 = vmul.f32 2.0, %v1304_v12  ;;  %v350_v49 = vadd.f32 %v1582_v52, %v1686_v34 }
 0x1b5   :  { %v852_v60 = vsel %vm850_vm5, %v851_v56, %v849_v58  ;;  %v492_v40 = vsel %vm460_vm8, %v1735_v26, -1e+30  ;;  %v349_v34 = vadd.f32 %v1582_v52, %v1676_v20  ;;  %v368_v58 = vmul.f32 2.0, %v1310_v8 }
 0x1b6   :  { %vm1073_vm6 = vcmp.ge.f32.partialorder %v852_v60, %v708_v59  ;;  %v1009_v63 = vsub.f32 %v708_v59, %v852_v60  ;;  %v1774_v18 = vsub.f32 %v348_v17, %v364_v33  ;;  %v219_v59 = vpop.f32.mrf.mxu1  ;;  %v1786_v60 = vpop.permute.xlu0 %440  ;;  %v1798_v0 = vsub.f32 %v350_v49, %v366_v46 }
 0x1b7   :  { %v1708_v2 = vpop.permute.xlu1 %419  ;;  %v1105_v3 = vsel %vm1073_vm6, 1.0, %v1389_v54  ;;  %v381_v54 = vsub.f32 %v349_v34, %v365_v47  ;;  %vm469_vm2 = vcmp.eq.s32.totalorder %v1786_v60, %v1590_v57  ;;  %v588_v46 = vsel %vm459_vm7, 1e+30, %v1711_v5 }
 0x1b8   :  { %v1161_v4 = vsel %vm28_vm1, %v1105_v3, 0.0  ;;  %v1025_v6 = vadd.f32 0.3, %v1009_v63  ;;  %vm462_vm10 = vcmp.eq.s32.totalorder %v1708_v2, %v1590_v57  ;;  %v352_v63 = vadd.f32 %v1582_v52, %v1690_v36 }
 0x1b9   :  { %1192 = vadd.xlane.f32.xlu0 %v1161_v4  ;;  %v494_v51 = vsel %vm462_vm10, %v1757_v45, -1e+30  ;;  %v497_v20 = vsel %vm465_vm13, %v1774_v18, -1e+30  ;;  %v351_v36 = vadd.f32 %v1582_v52, %v1679_v25  ;;  %v370_v3 = vmul.f32 2.0, %v1313_v48  ;;  %v1316_v4 = vpop.f32.mrf.mxu1 }
 0x1ba   :  { %v1041_v11 = vmax.f32 %v1025_v6, 0.0  ;;  %v354_v6 = vadd.f32 %v1582_v52, %v1694_v39  ;;  %v499_v8 = vsel %vm467_vm15, %v1798_v0, -1e+30  ;;  %v384_v10 = vsub.f32 %v352_v63, %v368_v58  ;;  %v447_v25 = vpop.permute.xlu0 %446  ;;  %v476_v58 = vld [vmem:[#allocation2 + $0x10] sm:$0xff] }
 0x1bb   :  { %v1718_v13 = vpop.permute.xlu1 %425  ;;  %v383_v12 = vsub.f32 %v351_v36, %v367_v1  ;;  %v353_v39 = vadd.f32 %v1582_v52, %v1682_v29  ;;  %v372_v21 = vmul.f32 2.0, %v1316_v4  ;;  %vm471_vm4 = vcmp.eq.s32.totalorder %v447_v25, %v1590_v57  ;;  %v479_v1 = vld [vmem:[#allocation2 + $0x28] sm:$0xff]  ;;  %v480_v25 = vld [vmem:[#allocation2 + $0x30] sm:$0xff] }
 0x1bc   :  { %v1121_v22 = vsel %vm28_vm1, %v1041_v11, 0.0  ;;  %vm464_vm12 = vcmp.eq.s32.totalorder %v1718_v13, %v1590_v57  ;;  %v369_v11 = vmul.f32 2.0, %v219_v59  ;;  %v501_v23 = vsel %vm469_vm2, %v384_v10, -1e+30 }
 0x1bd   :  { %508 = vmax.xlane.f32.xlu0 %v491_v15  ;;  %1152 = vadd.xlane.f32.xlu1 %v1121_v22  ;;  %v496_v62 = vsel %vm464_vm12, %v1780_v55, -1e+30  ;;  %v229_v15 = vpop.f32.mrf.mxu1  ;;  %v356_v22 = vadd.f32 %v1582_v52, %v1696_v43  ;;  %v386_v27 = vsub.f32 %v354_v6, %v370_v3  ;;  %v355_v43 = vadd.f32 %v1582_v52, %v1688_v35 }
 0x1be   :  { %v371_v29 = vmul.f32 2.0, %v229_v15  ;;  %v385_v30 = vsub.f32 %v353_v39, %v369_v11  ;;  %v589_v35 = vsel %vm460_vm8, 1e+30, %v1735_v26  ;;  %v591_v48 = vsel %vm462_vm10, 1e+30, %v1757_v45  ;;  %v475_v45 = vld [vmem:[#allocation2 + $0x8] sm:$0xff] }
 0x1bf   :  { %v1745_v38 = vpop.permute.xlu1 %431  ;;  %v503_v33 = vsel %vm471_vm4, %v386_v27, -1e+30  ;;  %v590_v49 = vsel %vm461_vm9, 1e+30, %v1720_v14  ;;  %v593_v37 = vsel %vm464_vm12, 1e+30, %v1780_v55 }
 0x1c0   :  { %vm466_vm14 = vcmp.eq.s32.totalorder %v1745_v38, %v1590_v57  ;;  %v387_v42 = vsub.f32 %v355_v43, %v371_v29  ;;  %v592_v53 = vsel %vm463_vm11, 1e+30, %v1751_v41  ;;  %v594_v44 = vsel %vm465_vm13, 1e+30, %v1774_v18  ;;  %v485_v43 = vld [vmem:[#allocation2 + $0x58] sm:$0xff] }
 0x1c1   :  { %512 = vmax.xlane.f32.xlu0 %v493_v32  ;;  %510 = vmax.xlane.f32.xlu1 %v492_v40  ;;  %v498_v9 = vsel %vm466_vm14, %v381_v54, -1e+30  ;;  %v453_v32 = vpop.permute.xlu0 %452  ;;  %v388_v40 = vsub.f32 %v356_v22, %v372_v21  ;;  %v595_v2 = vsel %vm466_vm14, 1e+30, %v381_v54  ;;  %v596_v61 = vsel %vm467_vm15, 1e+30, %v1798_v0 }
 0x1c2   :  { %vm473_vm6 = vcmp.eq.s32.totalorder %v453_v32, %v1590_v57  ;;  %v598_v14 = vsel %vm469_vm2, 1e+30, %v384_v10  ;;  %v600_v26 = vsel %vm471_vm4, 1e+30, %v386_v27  ;;  %v478_v54 = vld [vmem:[#allocation2 + $0x20] sm:$0xff]  ;;  %v481_v10 = vld [vmem:[#allocation2 + $0x38] sm:$0xff] }
 0x1c3   :  { %v1782_v56 = vpop.permute.xlu1 %437  ;;  %v505_v31 = vsel %vm473_vm6, %v388_v40, -1e+30  ;;  %v602_v38 = vsel %vm473_vm6, 1e+30, %v388_v40  ;;  %v484_v32 = vld [vmem:[#allocation2 + $0x50] sm:$0xff] }
 0x1c4   :  { %vm468_vm0 = vcmp.eq.s32.totalorder %v1782_v56, %v1590_v57  ;;  %v477_v56 = vld [vmem:[#allocation2 + $0x18] sm:$0xff] }
 0x1c5   :  { %516 = vmax.xlane.f32.xlu0 %v495_v50  ;;  %514 = vmax.xlane.f32.xlu1 %v494_v51  ;;  %v500_v24 = vsel %vm468_vm0, %v383_v12, -1e+30  ;;  %v597_v5 = vsel %vm468_vm0, 1e+30, %v383_v12 }
 0x1c7   :  { %v444_v7 = vpop.permute.xlu1 %443 }
 0x1c8   :  { %vm470_vm3 = vcmp.eq.s32.totalorder %v444_v7, %v1590_v57 }
 0x1c9   :  { %520 = vmax.xlane.f32.xlu0 %v497_v20  ;;  %518 = vmax.xlane.f32.xlu1 %v496_v62  ;;  %v502_v17 = vsel %vm470_vm3, %v385_v30, -1e+30  ;;  %v599_v13 = vsel %vm470_vm3, 1e+30, %v385_v30 }
 0x1cb   :  { %v450_v28 = vpop.permute.xlu1 %449 }
 0x1cc   :  { %vm472_vm5 = vcmp.eq.s32.totalorder %v450_v28, %v1590_v57 }
 0x1cd   :  { %524 = vmax.xlane.f32.xlu0 %v499_v8  ;;  %522 = vmax.xlane.f32.xlu1 %v498_v9  ;;  %v504_v52 = vsel %vm472_vm5, %v387_v42, -1e+30  ;;  %v601_v19 = vsel %vm472_vm5, 1e+30, %v387_v42 }
 0x1d1   :  { %528 = vmax.xlane.f32.xlu0 %v501_v23  ;;  %526 = vmax.xlane.f32.xlu1 %v500_v24  ;;  %v483_v23 = vld [vmem:[#allocation2 + $0x48] sm:$0xff]  ;;  %v482_v24 = vld [vmem:[#allocation2 + $0x40] sm:$0xff] }
 0x1d5   :  { %532 = vmax.xlane.f32.xlu0 %v503_v33  ;;  %530 = vmax.xlane.f32.xlu1 %v502_v17 }
 0x1d9   :  { %536 = vmax.xlane.f32.xlu0 %v505_v31  ;;  %534 = vmax.xlane.f32.xlu1 %v504_v52  ;;  %v487_v31 = vld [vmem:[#allocation2 + $0x68] sm:$0xff]  ;;  %v486_v52 = vld [vmem:[#allocation2 + $0x60] sm:$0xff] }
 0x1dd   :  { %607 = vmin.xlane.f32.xlu0 %v589_v35  ;;  %605 = vmin.xlane.f32.xlu1 %v588_v46 }
 0x1e1   :  { %611 = vmin.xlane.f32.xlu0 %v591_v48  ;;  %609 = vmin.xlane.f32.xlu1 %v590_v49 }
 0x1e5   :  { %615 = vmin.xlane.f32.xlu0 %v593_v37  ;;  %613 = vmin.xlane.f32.xlu1 %v592_v53  ;;  %v489_v37 = vld [vmem:[#allocation2 + $0x78] sm:$0xff]  ;;  %v488_v53 = vld [vmem:[#allocation2 + $0x70] sm:$0xff] }
 0x1e9   :  { %619 = vmin.xlane.f32.xlu0 %v595_v2  ;;  %617 = vmin.xlane.f32.xlu1 %v594_v44 }
 0x1ed   :  { %623 = vmin.xlane.f32.xlu0 %v597_v5  ;;  %621 = vmin.xlane.f32.xlu1 %v596_v61 }
 0x1f1   :  { %627 = vmin.xlane.f32.xlu0 %v599_v13  ;;  %625 = vmin.xlane.f32.xlu1 %v598_v14  ;;  %v573_v13 = vld [vmem:[#allocation3 + $0x10] sm:$0xff]  ;;  %v572_v14 = vld [vmem:[#allocation3 + $0x8] sm:$0xff] }
 0x1f5   :  { %631 = vmin.xlane.f32.xlu0 %v601_v19  ;;  %629 = vmin.xlane.f32.xlu1 %v600_v26 }
 0x1f9   :  { %633 = vmin.xlane.f32.xlu1 %v602_v38 }
 0x242   :  { %v1193_v41 = vpop.xlane.xlu0 %1192 }
 0x243   :  { %v1194_v16 = vrot.slane %v1193_v41, 4 }
 0x245   :  { %v1195_v50 = vadd.f32 %v1194_v16, %v1193_v41  ;;  %v575_v16 = vld [vmem:[#allocation3 + $0x20] sm:$0xff] }
 0x246   :  { %v509_v51 = vpop.xlane.xlu0 %508  ;;  %v1153_v18 = vpop.xlane.xlu1 %1152 }
 0x247   :  { %v1196_v34 = vrot.slane %v1195_v50, 2  ;;  %v539_v47 = vmax.f32 %v475_v45, %v509_v51  ;;  %v1154_v55 = vrot.slane %v1153_v18, 4  ;;  %v574_v45 = vld [vmem:[#allocation3 + $0x18] sm:$0xff] }
 0x249   :  { %556 = vst.msk [vmem:[#allocation2 + $0x8] sm:$0xff] %vm28_vm1, %v539_v47  ;;  %v1155_v59 = vadd.f32 %v1154_v55, %v1153_v18  ;;  %v1197_v20 = vadd.f32 %v1196_v34, %v1195_v50  ;;  %v577_v47 = vld [vmem:[#allocation3 + $0x30] sm:$0xff]  ;;  %v576_v55 = vld [vmem:[#allocation3 + $0x28] sm:$0xff] }
 0x24a   :  { %v513_v60 = vpop.xlane.xlu0 %512  ;;  %v511_v63 = vpop.xlane.xlu1 %510 }
 0x24b   :  { %v1156_v57 = vrot.slane %v1155_v59, 2  ;;  %v541_v62 = vmax.f32 %v477_v56, %v513_v60  ;;  %v540_v0 = vmax.f32 %v476_v58, %v511_v63  ;;  %v1198_v6 = vrot.slane %v1197_v20, 1  ;;  %v579_v63 = vld [vmem:[#allocation3 + $0x40] sm:$0xff] }
 0x24d   :  { %558 = vst.msk [vmem:[#allocation2 + $0x18] sm:$0xff] %vm28_vm1, %v541_v62  ;;  %557 = vst.msk [vmem:[#allocation2 + $0x10] sm:$0xff] %vm28_vm1, %v540_v0  ;;  %v1157_v36 = vadd.f32 %v1156_v57, %v1155_v59  ;;  %v1199_v21 = vadd.f32 %v1198_v6, %v1197_v20  ;;  %v578_v20 = vld [vmem:[#allocation3 + $0x38] sm:$0xff] }
 0x24e   :  { %v517_v3 = vpop.xlane.xlu0 %516  ;;  %v515_v4 = vpop.xlane.xlu1 %514 }
 0x24f   :  { %v543_v7 = vmax.f32 %v479_v1, %v517_v3  ;;  %v542_v8 = vmax.f32 %v478_v54, %v515_v4  ;;  %v1158_v9 = vrot.slane %v1157_v36, 1  ;;  %v581_v54 = vld [vmem:[#allocation3 + $0x50] sm:$0xff] }
 0x251   :  { %560 = vst.msk [vmem:[#allocation2 + $0x28] sm:$0xff] %vm28_vm1, %v543_v7  ;;  %559 = vst.msk [vmem:[#allocation2 + $0x20] sm:$0xff] %vm28_vm1, %v542_v8  ;;  %v1159_v11 = vadd.f32 %v1158_v9, %v1157_v36  ;;  %v580_v36 = vld [vmem:[#allocation3 + $0x48] sm:$0xff]  ;;  %v583_v8 = vld [vmem:[#allocation3 + $0x60] sm:$0xff] }
 0x252   :  { %v521_v12 = vpop.xlane.xlu0 %520  ;;  %v519_v39 = vpop.xlane.xlu1 %518  ;;  %v582_v9 = vld [vmem:[#allocation3 + $0x58] sm:$0xff] }
 0x253   :  { %v545_v15 = vmax.f32 %v481_v10, %v521_v12  ;;  %v544_v22 = vmax.f32 %v480_v25, %v519_v39  ;;  %1349 = vpush %v1159_v11  ;;  %v959_v10 = vlaneseq }
 0x254   :  { %1351 = vpush %v1199_v21  ;;  %v585_v21 = vld [vmem:[#allocation3 + $0x70] sm:$0xff] }
 0x255   :  { %562 = vst.msk [vmem:[#allocation2 + $0x38] sm:$0xff] %vm28_vm1, %v545_v15  ;;  %561 = vst.msk [vmem:[#allocation2 + $0x30] sm:$0xff] %vm28_vm1, %v544_v22  ;;  %v584_v15 = vld [vmem:[#allocation3 + $0x68] sm:$0xff]  ;;  %v960_v22 = vshrl.u32 %v959_v10, 7 }
 0x256   :  { %v525_v27 = vpop.xlane.xlu0 %524  ;;  %v523_v29 = vpop.xlane.xlu1 %522 }
 0x257   :  { %v547_v28 = vmax.f32 %v483_v23, %v525_v27  ;;  %v546_v30 = vmax.f32 %v482_v24, %v523_v29  ;;  %v1202_v23 = vand.u32 127, %v959_v10  ;;  %vm1203_vm7 = vcmp.eq.s32.totalorder %v960_v22, 0 }
 0x259   :  { %564 = vst.msk [vmem:[#allocation2 + $0x48] sm:$0xff] %vm28_vm1, %v547_v28  ;;  %563 = vst.msk [vmem:[#allocation2 + $0x40] sm:$0xff] %vm28_vm1, %v546_v30  ;;  %v586_v30 = vld [vmem:[#allocation3 + $0x78] sm:$0xff]  ;;  %vm1206_vm8 = vcmp.eq.s32.totalorder %v1202_v23, 1  ;;  %vm1204_vm9 = vcmp.eq.s32.totalorder %v1202_v23, 0 }
 0x25a   :  { %v529_v33 = vpop.xlane.xlu0 %528  ;;  %v527_v17 = vpop.xlane.xlu1 %526  ;;  %vm1207_vm10 = vmand %vm1203_vm7, %vm1206_vm8 }
 0x25b   :  { %v549_v40 = vmax.f32 %v485_v43, %v529_v33  ;;  %v548_v42 = vmax.f32 %v484_v32, %v527_v17  ;;  %vm1205_vm11 = vmand %vm1203_vm7, %vm1204_vm9 }
 0x25d   :  { %566 = vst.msk [vmem:[#allocation2 + $0x58] sm:$0xff] %vm28_vm1, %v549_v40  ;;  %565 = vst.msk [vmem:[#allocation2 + $0x50] sm:$0xff] %vm28_vm1, %v548_v42 }
 0x25e   :  { %v533_v35 = vpop.xlane.xlu0 %532  ;;  %v531_v46 = vpop.xlane.xlu1 %530 }
 0x25f   :  { %v551_v48 = vmax.f32 %v487_v31, %v533_v35  ;;  %v550_v49 = vmax.f32 %v486_v52, %v531_v46 }
 0x261   :  { %568 = vst.msk [vmem:[#allocation2 + $0x68] sm:$0xff] %vm28_vm1, %v551_v48  ;;  %567 = vst.msk [vmem:[#allocation2 + $0x60] sm:$0xff] %vm28_vm1, %v550_v49 }
 0x262   :  { %v537_v2 = vpop.xlane.xlu0 %536  ;;  %v535_v44 = vpop.xlane.xlu1 %534 }
 0x263   :  { %v553_v5 = vmax.f32 %v489_v37, %v537_v2  ;;  %v552_v61 = vmax.f32 %v488_v53, %v535_v44 }
 0x265   :  { %570 = vst.msk [vmem:[#allocation2 + $0x78] sm:$0xff] %vm28_vm1, %v553_v5  ;;  %569 = vst.msk [vmem:[#allocation2 + $0x70] sm:$0xff] %vm28_vm1, %v552_v61 }
 0x266   :  { %v608_v19 = vpop.xlane.xlu0 %607  ;;  %v606_v26 = vpop.xlane.xlu1 %605 }
 0x267   :  { %v637_v38 = vmin.f32 %v573_v13, %v608_v19  ;;  %v636_v41 = vmin.f32 %v572_v14, %v606_v26 }
 0x269   :  { %653 = vst.msk [vmem:[#allocation3 + $0x10] sm:$0xff] %vm28_vm1, %v637_v38  ;;  %652 = vst.msk [vmem:[#allocation3 + $0x8] sm:$0xff] %vm28_vm1, %v636_v41 }
 0x26a   :  { %v612_v50 = vpop.xlane.xlu0 %611  ;;  %v610_v51 = vpop.xlane.xlu1 %609 }
 0x26b   :  { %v639_v18 = vmin.f32 %v575_v16, %v612_v50  ;;  %v638_v34 = vmin.f32 %v574_v45, %v610_v51 }
 0x26d   :  { %655 = vst.msk [vmem:[#allocation3 + $0x20] sm:$0xff] %vm28_vm1, %v639_v18  ;;  %654 = vst.msk [vmem:[#allocation3 + $0x18] sm:$0xff] %vm28_vm1, %v638_v34 }
 0x26e   :  { %v616_v56 = vpop.xlane.xlu0 %615  ;;  %v614_v58 = vpop.xlane.xlu1 %613 }
 0x26f   :  { %v641_v59 = vmin.f32 %v577_v47, %v616_v56  ;;  %v640_v60 = vmin.f32 %v576_v55, %v614_v58 }
 0x271   :  { %657 = vst.msk [vmem:[#allocation3 + $0x30] sm:$0xff] %vm28_vm1, %v641_v59  ;;  %656 = vst.msk [vmem:[#allocation3 + $0x28] sm:$0xff] %vm28_vm1, %v640_v60 }
 0x272   :  { %v620_v57 = vpop.xlane.xlu0 %619  ;;  %v618_v62 = vpop.xlane.xlu1 %617 }
 0x273   :  { %v643_v0 = vmin.f32 %v579_v63, %v620_v57  ;;  %v642_v1 = vmin.f32 %v578_v20, %v618_v62 }
 0x275   :  { %659 = vst.msk [vmem:[#allocation3 + $0x40] sm:$0xff] %vm28_vm1, %v643_v0  ;;  %658 = vst.msk [vmem:[#allocation3 + $0x38] sm:$0xff] %vm28_vm1, %v642_v1 }
 0x276   :  { %v624_v3 = vpop.xlane.xlu0 %623  ;;  %v622_v4 = vpop.xlane.xlu1 %621 }
 0x277   :  { %v645_v6 = vmin.f32 %v581_v54, %v624_v3  ;;  %v644_v7 = vmin.f32 %v580_v36, %v622_v4 }
 0x279   :  { %661 = vst.msk [vmem:[#allocation3 + $0x50] sm:$0xff] %vm28_vm1, %v645_v6  ;;  %660 = vst.msk [vmem:[#allocation3 + $0x48] sm:$0xff] %vm28_vm1, %v644_v7 }
 0x27a   :  { %v628_v25 = vpop.xlane.xlu0 %627  ;;  %v626_v11 = vpop.xlane.xlu1 %625 }
 0x27b   :  { %v647_v12 = vmin.f32 %v583_v8, %v628_v25  ;;  %v646_v39 = vmin.f32 %v582_v9, %v626_v11 }
 0x27d   :  { %663 = vst.msk [vmem:[#allocation3 + $0x60] sm:$0xff] %vm28_vm1, %v647_v12  ;;  %662 = vst.msk [vmem:[#allocation3 + $0x58] sm:$0xff] %vm28_vm1, %v646_v39 }
 0x27e   :  { %v632_v24 = vpop.xlane.xlu0 %631  ;;  %v630_v27 = vpop.xlane.xlu1 %629 }
 0x27f   :  { %v649_v29 = vmin.f32 %v585_v21, %v632_v24  ;;  %v648_v28 = vmin.f32 %v584_v15, %v630_v27 }
 0x281   :  { %665 = vst.msk [vmem:[#allocation3 + $0x70] sm:$0xff] %vm28_vm1, %v649_v29  ;;  %664 = vst.msk [vmem:[#allocation3 + $0x68] sm:$0xff] %vm28_vm1, %v648_v28 }
 0x282   :  { %v634_v43 = vpop.xlane.xlu1 %633 }
 0x283   :  { %v650_v32 = vmin.f32 %v586_v30, %v634_v43 }
 0x284   :  { %s1350_s4 = spop %1349 }
 0x285   :  { %666 = vst.msk [vmem:[#allocation3 + $0x78] sm:$0xff] %vm28_vm1, %v650_v32  ;;  %v1210_v33 = vstv %s1350_s4  ;;  %s1352_s27 = spop %1351 }
 0x286   :  { %v1208_v17 = vstv %s1352_s27 }
 0x287   :  { %v1209_v40 = vsel %vm1207_vm10, %v1208_v17, 0.0 }
 0x288   :  { %v1211_v42 = vsel %vm1205_vm11, %v1210_v33, %v1209_v40 }
 0x289   :  { %1212 = vst [vmem:[#allocation4] sm:$0xff] %v1211_v42 }
 0x28a   :  { %1375 = shalt.err (!%p1372_p4)
}
 0x28b   :  { %1222 = dma.vmem_to_hbm [thread:$0]  %s1220_s0, 128, %s1931_s6, [#allocation5]  }
 0x28c   :  { %1384 = dma.done.wait [#allocation5], 128  }
 0x28d   :  { %1385 = vsyncadd [#allocation5], 4294967168 }
 0x28e   :  { %1226 = vsyncpa [#allocation5], 1 }

</bundles_post_ra>
